<compile_context>
chip_gen: v5e
topology: v5e:2x2
jax: 0.10.0
libtpu: 0.0.40
codegen_flags: <defaults>
</compile_context>

<pallas_src>
import math

import jax
import jax.numpy as jnp
from jax.experimental import pallas as pl
from jax.experimental.pallas import tpu as pltpu

NUM_CLASSES = 7
IN_FEATURES = 32
LANES = 128


def _round_up(n, m):
    return ((n + m - 1) // m) * m


def _choose_pack(f_in):
    # Pack enough examples per row that the packed K dim is a multiple of 128 lanes,
    # preferably 256 to fill the v6e/v7x MXU K dimension (f_in=32 -> pack=8).
    if 256 % f_in == 0:
        return 256 // f_in
    if LANES % f_in == 0:
        return LANES // f_in
    return 1


def _linear_kernel(x_ref, w_ref, b_ref, o_ref):
    # x_ref: (TBP, 256)  w_ref: (256, 56)  b_ref: (1, 56)  o_ref: (TBP, 56)
    y = jnp.dot(x_ref[...], w_ref[...], preferred_element_type=jnp.float32)
    o_ref[...] = (y + b_ref[...]).astype(o_ref.dtype)


def pack_params(weight, bias):
    """Precompute lane-dense packed parameters from PyTorch-layout params.

    Call once at parameter-init time and pass the result to
    `mlp_classifier_forward(..., packed_params=...)`.

    Args:
      weight: [F_out, F_in] (PyTorch nn.Linear layout)
      bias:   [F_out]
    Returns:
      w_packed: [pack*F_in, pack*F_out] block-diagonal (pack = _choose_pack(F_in))
      b_packed: [1, pack*F_out]
    """
    f_out, f_in = weight.shape
    pack = _choose_pack(f_in)
    w_t = weight.T  # (F_in, F_out)
    if pack > 1:
        eye = jnp.eye(pack, dtype=weight.dtype)
        w_packed = jnp.kron(eye, w_t)                      # (pack*F_in, pack*F_out)
        b_packed = jnp.tile(bias, pack).reshape(1, pack * f_out)
    else:
        w_packed = w_t
        b_packed = bias.reshape(1, f_out)
    return w_packed, b_packed


def mlp_classifier_forward(x, weight, bias, *, packed_params=None, block_rows=4096):
    """Pallas forward of mlp_classifier: y = x @ weight.T + bias.

    Args:
      x:      [B, 32] float32 (or bfloat16; accumulation is always f32)
      weight: [num_classes, 32] (PyTorch layout: (out, in))
      bias:   [num_classes]
      packed_params: optional (w_packed, b_packed) from `pack_params` (hoist to init).
      block_rows: packed-row tile size (multiple of 8). 4096 packed rows == 32768
                  examples/step, ~12 MiB double-buffered VMEM (fits all generations).
    Returns:
      [B, num_classes], dtype of x.
    """
    B, f_in = x.shape
    f_out = weight.shape[0]
    pack = _choose_pack(f_in)
    packed_in = pack * f_in
    packed_out = pack * f_out

    if packed_params is None:
        packed_params = pack_params(weight, bias)
    w_packed, b_packed = packed_params

    # Pad only to the pack*8 (=64 example) granularity so the packed array has a
    # whole number of 8-row sublane groups; <= 63 padded rows total (the old
    # full-block tbp*pack padding is gone).
    rows_needed = pl.cdiv(B, pack)
    rows = _round_up(max(rows_needed, 1), 8)
    b_padded = rows * pack

    # Packed-row tile (multiple of 8 sublanes).
    tbp = _round_up(block_rows, 8)
    if rows <= tbp:
        # Split small problems into at least two grid steps so both v7x TensorCores
        # get a batch slice (no-op on single-TC v5e/v6e); single step only at rows==8.
        tbp = max(8, _round_up(pl.cdiv(rows, 2), 8))
    grid = (pl.cdiv(rows, tbp),)

    if b_padded != B:
        x = jnp.pad(x, ((0, b_padded - B), (0, 0)))
    x_packed = x.reshape(rows, packed_in)  # contiguous -> free reshape, no copy

    itemsize = jnp.dtype(x.dtype).itemsize
    cost = pl.CostEstimate(
        flops=2 * B * f_in * f_out,
        transcendentals=0,
        bytes_accessed=int(
            rows * packed_in * itemsize          # x read
            + rows * packed_out * itemsize       # y write
            + w_packed.size * jnp.dtype(w_packed.dtype).itemsize
            + b_packed.size * jnp.dtype(b_packed.dtype).itemsize
        ),
    )

    out_packed = pl.pallas_call(
        _linear_kernel,
        out_shape=jax.ShapeDtypeStruct((rows, packed_out), x.dtype),
        grid_spec=pl.GridSpec(
            grid=grid,
            in_specs=[
                # x: tiled over the batch axis; ragged last block handled by Pallas
                # (OOB reads are garbage rows whose writes are masked -- safe, per-row op).
                pl.BlockSpec((tbp, packed_in), lambda i: (i, 0)),
                # weight / bias: constant index_map -> resident across grid steps.
                pl.BlockSpec((packed_in, packed_out), lambda i: (0, 0)),
                pl.BlockSpec((1, packed_out), lambda i: (0, 0)),
            ],
            out_specs=pl.BlockSpec((tbp, packed_out), lambda i: (i, 0)),
        ),
        compiler_params=pltpu.CompilerParams(
            # Batch steps are independent -> shard across v7x's 2 TensorCores.
            dimension_semantics=("parallel",),
            vmem_limit_bytes=32 << 20,
        ),
        cost_estimate=cost,
    )(x_packed, w_packed, b_packed)

    # Unpack: packed row r holds [y_{8r}, ..., y_{8r+7}] -> contiguous free reshape.
    out = out_packed.reshape(b_padded, f_out)
    if b_padded != B:
        # Only when B % (8*pack) != 0; <= 63-row over-allocation gets trimmed here.
        out = out[:B]
    return out


def init_params(key, num_classes=NUM_CLASSES, in_features=IN_FEATURES):
    """Deterministic init mimicking nn.Linear default: U(-1/sqrt(fan_in), 1/sqrt(fan_in))."""
    kw, kb = jax.random.split(key)
    bound = 1.0 / math.sqrt(in_features)
    weight = jax.random.uniform(
        kw, (num_classes, in_features), jnp.float32, -bound, bound
    )
    bias = jax.random.uniform(kb, (num_classes,), jnp.float32, -bound, bound)
    return weight, bias


if __name__ == "__main__":
    key = jax.random.PRNGKey(0)
    k_p, k1, k2, k3 = jax.random.split(key, 4)

    weight, bias = init_params(k_p)
    packed = pack_params(weight, bias)  # hoisted: pack once, reuse per call

    def ref(x):
        return x @ weight.T + bias

    # 1) Tiny batch: single 8-row packed block.
    x1 = jax.random.normal(k1, (8, IN_FEATURES), dtype=jnp.float32)
    o1 = jax.block_until_ready(
        mlp_classifier_forward(x1, weight, bias, packed_params=packed)
    )
    assert o1.shape == (8, NUM_CLASSES)
    assert jnp.allclose(o1, ref(x1), atol=1e-5, rtol=1e-5)

    # 2) Ragged batch + multi-step grid + ragged (masked) edge block.
    x2 = jax.random.normal(k2, (312, IN_FEATURES), dtype=jnp.float32)
    o2 = jax.block_until_ready(
        mlp_classifier_forward(x2, weight, bias, packed_params=packed, block_rows=16)
    )
    assert o2.shape == (312, NUM_CLASSES)
    assert jnp.allclose(o2, ref(x2), atol=1e-5, rtol=1e-5)

    # 3) Small batch, default tile: exercises the split-into-two-grid-steps path.
    x3 = jax.random.normal(k3, (256, IN_FEATURES), dtype=jnp.float32)
    o3 = jax.block_until_ready(
        mlp_classifier_forward(x3, weight, bias, packed_params=packed)
    )
    assert o3.shape == (256, NUM_CLASSES)
    assert jnp.allclose(o3, ref(x3), atol=1e-5, rtol=1e-5)

    print("KERNEL_OK")
</pallas_src>

<mosaic_0001>
module attributes {stable_mosaic.version = 11 : i64} {
  func.func @_linear_kernel(%arg0: i32, %arg1: memref<8x256xf32, #tpu.memory_space<vmem>>, %arg2: memref<256x56xf32, #tpu.memory_space<vmem>>, %arg3: memref<1x56xf32, #tpu.memory_space<vmem>>, %arg4: memref<8x56xf32, #tpu.memory_space<vmem>>) attributes {dimension_semantics = [#tpu.dimension_semantics<parallel>], iteration_bounds = array<i64: 1>, scalar_prefetch = 0 : i64, scratch_operands = 0 : i64, tpu.core_type = #tpu.core_type<tc>, window_params = [{transform_indices = @transform_0, window_bounds = array<i64: 8, 256>}, {pipeline_mode = #tpu.pipeline_mode<synchronous>, transform_indices = @transform_1, window_bounds = array<i64: 256, 56>}, {pipeline_mode = #tpu.pipeline_mode<synchronous>, transform_indices = @transform_2, window_bounds = array<i64: 1, 56>}, {transform_indices = @transform_3, window_bounds = array<i64: 8, 56>}]} {
    %c0 = arith.constant 0 : index
    %c0_0 = arith.constant 0 : index
    %0 = vector.load %arg1[%c0, %c0_0] : memref<8x256xf32, #tpu.memory_space<vmem>>, vector<8x256xf32>
    %c0_1 = arith.constant 0 : index
    %c0_2 = arith.constant 0 : index
    %1 = vector.load %arg2[%c0_1, %c0_2] : memref<256x56xf32, #tpu.memory_space<vmem>>, vector<256x56xf32>
    %cst = arith.constant dense<0.000000e+00> : vector<8x56xf32>
    %2 = tpu.matmul %0, %1, %cst {dimension_numbers = #tpu.dot_dimension_numbers<[1], [0], [0], [1], [0, 0, 1, 1], [], []>} : vector<8x256xf32>, vector<256x56xf32>, vector<8x56xf32> -> vector<8x56xf32>
    %c0_3 = arith.constant 0 : index
    %c0_4 = arith.constant 0 : index
    %3 = vector.load %arg3[%c0_3, %c0_4] : memref<1x56xf32, #tpu.memory_space<vmem>>, vector<1x56xf32>
    %4 = vector.broadcast %3 : vector<1x56xf32> to vector<8x56xf32>
    %5 = arith.addf %2, %4 : vector<8x56xf32>
    %c0_5 = arith.constant 0 : index
    %c0_6 = arith.constant 0 : index
    %6 = vector.load %arg4[%c0_5, %c0_6] : memref<8x56xf32, #tpu.memory_space<vmem>>, vector<8x56xf32>
    tpu.vector_store %arg4[%c0_5, %c0_6], %5 {strides = array<i32>} : memref<8x56xf32, #tpu.memory_space<vmem>>, vector<8x56xf32>,
    return
  }
  func.func @transform_0(%arg0: i32) -> (i32, i32) {
    %c0_i32 = arith.constant 0 : i32
    %c0_i32_0 = arith.constant 0 : i32
    return %arg0, %c0_i32 : i32, i32
  }
  func.func @transform_1(%arg0: i32) -> (i32, i32) {
    %c0_i32 = arith.constant 0 : i32
    %c0_i32_0 = arith.constant 0 : i32
    %c0_i32_1 = arith.constant 0 : i32
    return %c0_i32, %c0_i32_0 : i32, i32
  }
  func.func @transform_2(%arg0: i32) -> (i32, i32) {
    %c0_i32 = arith.constant 0 : i32
    %c0_i32_0 = arith.constant 0 : i32
    %c0_i32_1 = arith.constant 0 : i32
    return %c0_i32, %c0_i32_0 : i32, i32
  }
  func.func @transform_3(%arg0: i32) -> (i32, i32) {
    %c0_i32 = arith.constant 0 : i32
    %c0_i32_0 = arith.constant 0 : i32
    return %arg0, %c0_i32 : i32, i32
  }
}

</mosaic_0001>

<bundles_post_ra>
// kernel: tpu_custom_call.1
= control target key start
LH: loop header
LB: loop body
LE: loop exit
PB: predicated region body
PF: predicated region fallthrough
CT: control target
= control target key end

     0   :  { %s268_s0 = inlined_call_operand.vmem [shape: f32[8,256], index: 0, kind: input, shape index: {}]   ;;  %s269_s1 = inlined_call_operand.vmem [shape: f32[256,56], index: 1, kind: input, shape index: {}]   ;;  %s270_s2 = inlined_call_operand.vmem [shape: f32[1,56], index: 2, kind: input, shape index: {}]   ;;  %s271_s3 = inlined_call_operand.hbm [shape: f32[8,56], index: 3, kind: output, shape index: {}]  }
   0x1   :  { %v32_v0 = vld [vmem:[%s269_s1 + $0x78] sm:$0xff]  ;;  %v31_v1 = vld [vmem:[%s269_s1 + $0x70] sm:$0xff]  ;;  %v30_v4 = vld [vmem:[%s269_s1 + $0x68] sm:$0xff] }
   0x2   :  { %v48_v2 = vld [vmem:[%s269_s1 + $0xf8] sm:$0xff]  ;;  %53 = vmatpush.msra.mxu0 %v32_v0  ;;  %v47_v3 = vld [vmem:[%s269_s1 + $0xf0] sm:$0xff]  ;;  %v46_v5 = vld [vmem:[%s269_s1 + $0xe8] sm:$0xff] }
   0x3   :  { %73 = vmatpush.msra.mxu1 %v48_v2  ;;  %v29_v6 = vld [vmem:[%s269_s1 + $0x60] sm:$0xff]  ;;  %v28_v8 = vld [vmem:[%s269_s1 + $0x58] sm:$0xff]  ;;  %v27_v10 = vld [vmem:[%s269_s1 + $0x50] sm:$0xff] }
   0x4   :  { %54 = vmatpush.msra.mxu0 %v31_v1  ;;  %v45_v7 = vld [vmem:[%s269_s1 + $0xe0] sm:$0xff]  ;;  %v44_v9 = vld [vmem:[%s269_s1 + $0xd8] sm:$0xff]  ;;  %v43_v11 = vld [vmem:[%s269_s1 + $0xd0] sm:$0xff] }
   0x5   :  { %74 = vmatpush.msra.mxu1 %v47_v3  ;;  %v26_v12 = vld [vmem:[%s269_s1 + $0x48] sm:$0xff]  ;;  %v25_v14 = vld [vmem:[%s269_s1 + $0x40] sm:$0xff] }
   0x6   :  { %55 = vmatpush.msra.mxu0 %v30_v4  ;;  %v42_v13 = vld [vmem:[%s269_s1 + $0xc8] sm:$0xff]  ;;  %v41_v15 = vld [vmem:[%s269_s1 + $0xc0] sm:$0xff] }
   0x7   :  { %75 = vmatpush.msra.mxu1 %v46_v5 }
   0x8   :  { %56 = vmatpush.msra.mxu0 %v29_v6 }
   0x9   :  { %76 = vmatpush.msra.mxu1 %v45_v7 }
   0xa   :  { %57 = vmatpush.msra.mxu0 %v28_v8 }
   0xb   :  { %77 = vmatpush.msra.mxu1 %v44_v9 }
   0xc   :  { %58 = vmatpush.msra.mxu0 %v27_v10 }
   0xd   :  { %78 = vmatpush.msra.mxu1 %v43_v11 }
   0xe   :  { %8 = vsyncpa [#allocation3], 0  ;;  %59 = vmatpush.msra.mxu0 %v26_v12  ;;  %v24_v16 = vld [vmem:[%s269_s1 + $0x38] sm:$0xff]  ;;  %v23_v18 = vld [vmem:[%s269_s1 + $0x30] sm:$0xff]  ;;  %s102_s4 = sshll.u32 %s271_s3, 4  ;;  %vm93_vm0 = vcmask 457728   ;;  %s103_s4 = int_to_ptr.hbm [resolvable:$true] %s102_s4 }
   0xf   :  { %79 = vmatpush.msra.mxu1 %v42_v13  ;;  %v40_v17 = vld [vmem:[%s269_s1 + $0xb8] sm:$0xff]  ;;  %v39_v19 = vld [vmem:[%s269_s1 + $0xb0] sm:$0xff]  ;;  %v22_v20 = vld [vmem:[%s269_s1 + $0x28] sm:$0xff] }
  0x10   :  { %60 = vmatpush.msra.mxu0 %v25_v14  ;;  %v38_v21 = vld [vmem:[%s269_s1 + $0xa8] sm:$0xff]  ;;  %v21_v22 = vld [vmem:[%s269_s1 + $0x20] sm:$0xff]  ;;  %v20_v24 = vld [vmem:[%s269_s1 + $0x18] sm:$0xff] }
  0x11   :  { %80 = vmatpush.msra.mxu1 %v41_v15  ;;  %v37_v23 = vld [vmem:[%s269_s1 + $0xa0] sm:$0xff]  ;;  %v36_v25 = vld [vmem:[%s269_s1 + $0x98] sm:$0xff]  ;;  %v19_v26 = vld [vmem:[%s269_s1 + $0x10] sm:$0xff] }
  0x12   :  { %61 = vmatpush.msra.mxu0 %v24_v16  ;;  %v35_v27 = vld [vmem:[%s269_s1 + $0x90] sm:$0xff]  ;;  %v18_v28 = vld [vmem:[%s269_s1 + $0x8] sm:$0xff]  ;;  %v17_v30 = vld [vmem:[%s269_s1] sm:$0xff] }
  0x13   :  { %81 = vmatpush.msra.mxu1 %v40_v17  ;;  %v34_v29 = vld [vmem:[%s269_s1 + $0x88] sm:$0xff]  ;;  %v33_v31 = vld [vmem:[%s269_s1 + $0x80] sm:$0xff]  ;;  %s139_s1 = smov [#allocation2]  }
  0x14   :  { %62 = vmatpush.msra.mxu0 %v23_v18  ;;  %v15_v32 = vld [vmem:[%s268_s0] sm:$0xff]  ;;  %v16_v33 = vld [vmem:[%s268_s0 + $0x8] sm:$0xff]  ;;  %s100_s28 = sshll.u32 %s139_s1, 4  ;;  %s101_s28 = int_to_ptr.vmem [resolvable:$true] %s100_s28 }
  0x15   :  { %82 = vmatpush.msra.mxu1 %v39_v19  ;;  %v112_v34 = vld [vmem:[%s270_s2] ss:$0 sm:$0xff] }
  0x16   :  { %63 = vmatpush.msra.mxu0 %v22_v20 }
  0x17   :  { %83 = vmatpush.msra.mxu1 %v38_v21 }
  0x18   :  { %64 = vmatpush.msra.mxu0 %v21_v22 }
  0x19   :  { %84 = vmatpush.msra.mxu1 %v37_v23 }
  0x1a   :  { %65 = vmatpush.msra.mxu0 %v20_v24 }
  0x1b   :  { %85 = vmatpush.msra.mxu1 %v36_v25 }
  0x1c   :  { %66 = vmatpush.msra.mxu0 %v19_v26 }
  0x1d   :  { %86 = vmatpush.msra.mxu1 %v35_v27 }
  0x1e   :  { %67 = vmatpush.msra.mxu0 %v18_v28 }
  0x1f   :  { %87 = vmatpush.msra.mxu1 %v34_v29 }
  0x20   :  { %68 = vmatpush.msra.mxu0 %v17_v30 }
  0x21   :  { %88 = vmatpush.msra.mxu1 %v33_v31  ;;  %69 = vmatmul.f32.vlgmr.msra.gmra.mxu0 %v15_v32 }
  0x22   :  { %89 = vmatmul.f32.vlgmr.msra.gmra.mxu1 %v16_v33 }
  0x9e   :  { %v70_v35 = vpop.f32.mrf.mxu0 }
  0x9f   :  { %v90_v36 = vpop.f32.mrf.mxu1  ;;  %v71_v37 = vadd.f32 %v112_v34, %v70_v35 }
  0xa1   :  { %v91_v38 = vadd.f32 %v90_v36, %v71_v37 }
  0xa3   :  { %94 = vst.msk [vmem:[#allocation2] sm:$0xff] %vm93_vm0, %v91_v38 }
  0xa4   :  { %105 = dma.vmem_to_hbm [thread:$0]  %s101_s28, 128, %s103_s4, [#allocation3]  }
  0xa5   :  { %137 = dma.done.wait [#allocation3], 128  }
  0xa6   :  { %138 = vsyncadd [#allocation3], 4294967168 }
  0xa7   :  { %110 = vsyncpa [#allocation3], 1 }

</bundles_post_ra>
